<compile_context>
chip_gen: v6e
topology: v6e:2x2x1
jax: 0.10.0
libtpu: 0.0.40
codegen_flags: <defaults>
</compile_context>

<pallas_src>
import functools

import jax
import jax.numpy as jnp
from jax import lax
from jax.experimental import pallas as pl
from jax.experimental.pallas import tpu as pltpu


# ---------------------------------------------------------------------------
# One-time (cached) probe of pltpu.roll's rotate convention on this backend.
# True => np.roll convention: out[i] = in[(i - shift) % n].
# Must run on the same backend the kernel runs on (default TPU backend here).
# ---------------------------------------------------------------------------
@functools.lru_cache(maxsize=None)
def _roll_conventions():
    def lane_probe(x_ref, o_ref):
        o_ref[...] = pltpu.roll(x_ref[...], shift=1, axis=1)

    def sub_probe(x_ref, o_ref):
        o_ref[...] = pltpu.roll(x_ref[...], shift=1, axis=0)

    xl = jnp.broadcast_to(jnp.arange(128, dtype=jnp.float32), (8, 128))
    xs = jnp.broadcast_to(jnp.arange(8, dtype=jnp.float32)[:, None], (8, 128))
    ol = pl.pallas_call(
        lane_probe, out_shape=jax.ShapeDtypeStruct((8, 128), jnp.float32))(xl)
    osub = pl.pallas_call(
        sub_probe, out_shape=jax.ShapeDtypeStruct((8, 128), jnp.float32))(xs)
    return bool(ol[0, 0] == 127.0), bool(osub[0, 0] == 7.0)


def _pick_w_fold(W, c_exp, lane_target=128):
    """Smallest divisor of W with W_fold * c_exp >= lane_target (1 if c_exp>=128)."""
    need = max(1, -(-lane_target // c_exp))
    for f in range(need, W + 1):
        if W % f == 0:
            return f
    return W


# ---------------------------------------------------------------------------
# Fused EfficientBlock kernel.  One grid step = one batch image.
# Slab layout: rows = (h, wg) with wg the "super column" (W/W_fold of them),
#              lanes = (wl, c) with wl in [0, W_fold), c the channel.
# ---------------------------------------------------------------------------
def _fused_block_kernel(x_ref, w1_ref, s1_ref, b1_ref, wdw_ref, s2_ref, b2_ref,
                        wsq_ref, bsq_ref, wex_ref, bex_ref,
                        w3_ref, s3_ref, b3_ref,
                        mkl_ref, mtp_ref, mkr_ref, mtn_ref, mh0_ref, mh1_ref,
                        o_ref, *, C, Wg, lane_np, sub_np):
    def nroll(a, shift, axis, np_conv):
        # 'shift' given in np.roll convention; normalized for either backend
        # convention; zero shifts elided.
        n = a.shape[axis]
        s = (shift if np_conv else -shift) % n
        return pltpu.roll(a, shift=s, axis=axis) if s else a

    x = x_ref[...]                                           # (R, Wf*Cin) f32

    # ---- expand 1x1 conv (bf16 MXU matmul, f32 accumulation) + BN + Swish --
    h = jnp.dot(x.astype(jnp.bfloat16), w1_ref[...],
                preferred_element_type=jnp.float32)          # (R, Wf*C)
    h = h * s1_ref[...] + b1_ref[...]
    h = h * jax.nn.sigmoid(h)

    # ---- depthwise 3x3 conv + BN + Swish -----------------------------------
    # w-1 / w+1 taps: XLU lane roll by +-C; the wl==0 / wl==Wf-1 lane groups
    # take the neighbouring row's wrapped value (sublane roll by +-1).
    # h-1 / h+1 taps: sublane roll by +-Wg.  All edge masks precomputed (f32).
    rl = nroll(h, C, 1, lane_np)
    left = rl * mkl_ref[...] + nroll(rl, 1, 0, sub_np) * mtp_ref[...]
    rr = nroll(h, -C, 1, lane_np)
    right = rr * mkr_ref[...] + nroll(rr, -1, 0, sub_np) * mtn_ref[...]

    taps = wdw_ref[...]                                      # (9, Wf*C)
    not_h0 = mh0_ref[...]                                    # (R, 1)
    not_hl = mh1_ref[...]                                    # (R, 1)
    acc = jnp.zeros_like(h)
    for kx, col in ((0, left), (1, h), (2, right)):          # static unroll
        acc = acc + col * taps[3 + kx:4 + kx, :]                             # ky=1
        acc = acc + (nroll(col, Wg, 0, sub_np) * not_h0) * taps[kx:kx + 1, :]    # ky=0
        acc = acc + (nroll(col, -Wg, 0, sub_np) * not_hl) * taps[6 + kx:7 + kx, :]  # ky=2
    y = acc * s2_ref[...] + b2_ref[...]
    y = y * jax.nn.sigmoid(y)                                # (R, Wf*C)

    # ---- squeeze-excite -----------------------------------------------------
    # Global average pool folded into wsq (1/(H*W) baked in at pack time).
    # Squeeze/excite 1x1s are tiny (C x Cin//4): VPU broadcast-MACs, not MXU.
    col_sum = jnp.sum(y, axis=0, keepdims=True)              # (1, Wf*C)
    sq = jnp.sum(col_sum * wsq_ref[...], axis=1, keepdims=True) + bsq_ref[...]
    sq = sq * jax.nn.sigmoid(sq)                             # (Rse, 1) Swish
    ex = jnp.sum(sq * wex_ref[...], axis=0, keepdims=True) + bex_ref[...]
    y = y * jax.nn.sigmoid(ex)                               # per-channel gate

    # ---- project 1x1 conv + BN + shortcut -----------------------------------
    # TODO(synk): training-mode drop_connect / batch-stat BN not implemented.
    out = jnp.dot(y.astype(jnp.bfloat16), w3_ref[...],
                  preferred_element_type=jnp.float32)        # (R, Wf*Cout)
    o_ref[...] = out * s3_ref[...] + b3_ref[...] + x


# ---------------------------------------------------------------------------
# Wrapper: layout plumbing + the single fused pallas_call.
# ---------------------------------------------------------------------------
@functools.partial(jax.jit, static_argnames=("H", "W", "w_fold", "c_exp",
                                             "lane_np", "sub_np"))
def efficient_block_pallas(x_nhwc, params, *, H, W, w_fold, c_exp,
                           lane_np=True, sub_np=True):
    """x_nhwc: (B, H, W, Cin) f32 -> (B, H, W, Cout) f32 (eval, Cin == Cout)."""
    (w1big, s1t, b1t, wdw_t, s2t, b2t, wsq_t, bsq_c, wex_t, bex_t,
     w3big, s3t, b3t, mkl, mtp, mkr, mtn, mh0, mh1) = params
    B, _, _, Cin = x_nhwc.shape
    Wg = W // w_fold
    R = H * Wg                         # rows per image in the folded slab
    Kin = w_fold * Cin
    Kout = w3big.shape[1]              # w_fold * Cout
    Cout = Kout // w_fold
    assert Cin == Cout, "shortcut requires in_channel == out_channel"

    # Layout plumbing (wrapper side): (B,H,W,Cin) -> rows (b,h,wg), lanes (wl,c).
    x_slab = x_nhwc.reshape(B * R, Kin)

    kernel = functools.partial(_fused_block_kernel, C=c_exp, Wg=Wg,
                               lane_np=lane_np, sub_np=sub_np)

    # Constant weights / scales / masks: VMEM-resident, single-buffered.
    def resident(a):
        return pl.BlockSpec(a.shape, lambda b: (0, 0),
                            pipeline_mode=pl.Buffered(1))

    residents = (w1big, s1t, b1t, wdw_t, s2t, b2t, wsq_t, bsq_c, wex_t, bex_t,
                 w3big, s3t, b3t, mkl, mtp, mkr, mtn, mh0, mh1)

    # Advisory cost estimate for XLA scheduling around the custom call.
    n_pix = B * H * W
    flops = int(2 * n_pix * (Cin * c_exp + 9 * c_exp + c_exp * Cout)
                + 12 * n_pix * c_exp)
    transcendentals = int(2 * n_pix * c_exp + B * (c_exp + max(1, Cin // 4)))
    param_bytes = sum(int(p.size) * p.dtype.itemsize for p in residents)
    bytes_accessed = int(x_slab.size * 4 + B * R * Kout * 4 + param_bytes)

    out_slab = pl.pallas_call(
        kernel,
        out_shape=jax.ShapeDtypeStruct((B * R, Kout), jnp.float32),
        grid=(B,),
        in_specs=[pl.BlockSpec((R, Kin), lambda b: (b, 0))] +
                 [resident(a) for a in residents],
        out_specs=pl.BlockSpec((R, Kout), lambda b: (b, 0)),
        compiler_params=pltpu.CompilerParams(
            dimension_semantics=("parallel",),     # megacore split over images
            vmem_limit_bytes=32 * 1024 * 1024),
        cost_estimate=pl.CostEstimate(flops=flops,
                                      transcendentals=transcendentals,
                                      bytes_accessed=bytes_accessed),
    )(x_slab, *residents)

    return out_slab.reshape(B, H, W, Cout)


# ---------------------------------------------------------------------------
# Parameter packing (pure layout plumbing, done once outside the kernel).
# ---------------------------------------------------------------------------
def pack_params(w1, s1, b1, wdw, s2, b2, wsq, bsq, wex, bex, w3, s3, b3, H, W):
    C, Cin = w1.shape[0], w1.shape[1]
    Rse = wsq.shape[0]
    w_fold = _pick_w_fold(W, C)
    Wg = W // w_fold
    L = w_fold * C
    R = H * Wg
    f32 = jnp.float32

    eye_f = jnp.eye(w_fold, dtype=f32)
    # 1x1 convs as small block-diagonal matrices acting on (wl, c) lane groups;
    # bf16 operands for the MXU, accumulation stays f32 in-kernel.
    w1big = jnp.kron(eye_f, w1[:, :, 0, 0].T).astype(jnp.bfloat16)   # (Wf*Cin, L)
    w3big = jnp.kron(eye_f, w3[:, :, 0, 0].T).astype(jnp.bfloat16)   # (L, Wf*Cout)

    tile_l = lambda v: jnp.tile(v.reshape(1, -1), (1, w_fold))        # (1, Wf*len)
    wdw_t = jnp.tile(wdw[:, 0, :, :].reshape(C, 9).T, (1, w_fold))    # (9, L)
    wsq_t = jnp.tile(wsq[:, :, 0, 0], (1, w_fold)) / float(H * W)     # mean folded
    wex_t = jnp.tile(wex[:, :, 0, 0].T, (1, w_fold))                  # (Rse, L)
    bsq_c = bsq.reshape(Rse, 1)

    # Precomputed depthwise edge masks (f32 multiplicative).
    lane_wl = jnp.arange(L) // C          # lane -> folded column index wl
    row_wg = jnp.arange(R) % Wg           # row  -> super column index wg
    row_h = jnp.arange(R) // Wg           # row  -> h
    mkl = (lane_wl != 0).astype(f32)[None, :]                                   # keep lane-rolled
    mtp = ((lane_wl == 0)[None, :] & (row_wg != 0)[:, None]).astype(f32)        # take prev row
    mkr = (lane_wl != w_fold - 1).astype(f32)[None, :]
    mtn = ((lane_wl == w_fold - 1)[None, :] & (row_wg != Wg - 1)[:, None]).astype(f32)
    mh0 = (row_h != 0).astype(f32)[:, None]                                     # not top row
    mh1 = (row_h != H - 1).astype(f32)[:, None]                                 # not bottom row

    params = (w1big, tile_l(s1), tile_l(b1), wdw_t, tile_l(s2), tile_l(b2),
              wsq_t, bsq_c, wex_t, tile_l(bex), w3big, tile_l(s3), tile_l(b3),
              mkl, mtp, mkr, mtn, mh0, mh1)
    return params, w_fold


def bn_fold(gamma, beta, mean, var, eps=1e-3):
    scale = gamma / jnp.sqrt(var + eps)
    bias = beta - mean * scale
    return scale, bias


# ---------------------------------------------------------------------------
# Pure-JAX reference (NCHW, PyTorch eval-mode semantics).  The two 1x1 convs
# use bf16 operands with f32 accumulation (matching the kernel's MXU usage,
# documented ~1e-3-level deviation vs a pure-f32 PyTorch forward); everything
# else is exact f32.
# ---------------------------------------------------------------------------
def reference_forward(x_nchw, raw):
    (w1, s1, b1, wdw, s2, b2, wsq, bsq, wex, bex, w3, s3, b3, C) = raw
    dn = ('NCHW', 'OIHW', 'NCHW')
    sig = jax.nn.sigmoid
    hi = lax.Precision.HIGHEST
    bf = jnp.bfloat16
    f32 = jnp.float32

    y = lax.conv_general_dilated(x_nchw.astype(bf), w1.astype(bf), (1, 1), 'VALID',
                                 dimension_numbers=dn, preferred_element_type=f32)
    y = y * s1[None, :, None, None] + b1[None, :, None, None]
    y = y * sig(y)

    y = lax.conv_general_dilated(y, wdw, (1, 1), ((1, 1), (1, 1)),
                                 dimension_numbers=dn, feature_group_count=C,
                                 precision=hi)
    y = y * s2[None, :, None, None] + b2[None, :, None, None]
    y = y * sig(y)

    s = jnp.mean(y, axis=(2, 3), keepdims=True)
    s = lax.conv_general_dilated(s, wsq, (1, 1), 'VALID', dimension_numbers=dn,
                                 precision=hi)
    s = s + bsq[None, :, None, None]
    s = s * sig(s)
    s = lax.conv_general_dilated(s, wex, (1, 1), 'VALID', dimension_numbers=dn,
                                 precision=hi)
    s = sig(s + bex[None, :, None, None])
    y = y * s

    y = lax.conv_general_dilated(y.astype(bf), w3.astype(bf), (1, 1), 'VALID',
                                 dimension_numbers=dn, preferred_element_type=f32)
    y = y * s3[None, :, None, None] + b3[None, :, None, None]
    return y + x_nchw


if __name__ == "__main__":
    # Models EfficientBlock(in_channel=8, channel=32, out_channel=8,
    #   kernel_size=3, stride=1, zero_pad=[1,1,1,1], excite_size>0,
    #   drop_connect_rate=0.2) in eval mode, at small demo shapes.
    B, Cin, H, W = 2, 8, 16, 16
    C = 32                     # expanded channels
    Cout = Cin                 # shortcut requires in == out
    Rse = Cin // 4             # SE reduction channels

    key = jax.random.PRNGKey(0)
    ks = jax.random.split(key, 20)
    nrm = lambda k, shp, sc=0.1: sc * jax.random.normal(k, shp, jnp.float32)

    # PyTorch-shaped raw parameters (OIHW convs, per-channel BN running stats)
    w1 = nrm(ks[0], (C, Cin, 1, 1))
    g1 = 1.0 + nrm(ks[1], (C,)); be1 = nrm(ks[2], (C,))
    m1 = nrm(ks[3], (C,)); v1 = jax.random.uniform(ks[4], (C,), jnp.float32, 0.5, 1.5)

    wdw = nrm(ks[5], (C, 1, 3, 3))
    g2 = 1.0 + nrm(ks[6], (C,)); be2 = nrm(ks[7], (C,))
    m2 = nrm(ks[8], (C,)); v2 = jax.random.uniform(ks[9], (C,), jnp.float32, 0.5, 1.5)

    wsq = nrm(ks[10], (Rse, C, 1, 1)); bsq = nrm(ks[11], (Rse,))
    wex = nrm(ks[12], (C, Rse, 1, 1)); bex = nrm(ks[13], (C,))

    w3 = nrm(ks[14], (Cout, C, 1, 1))
    g3 = 1.0 + nrm(ks[15], (Cout,)); be3 = nrm(ks[16], (Cout,))
    m3 = nrm(ks[17], (Cout,)); v3 = jax.random.uniform(ks[18], (Cout,), jnp.float32, 0.5, 1.5)

    s1, b1 = bn_fold(g1, be1, m1, v1)
    s2, b2 = bn_fold(g2, be2, m2, v2)
    s3, b3 = bn_fold(g3, be3, m3, v3)

    params, w_fold = pack_params(w1, s1, b1, wdw, s2, b2, wsq, bsq, wex, bex,
                                 w3, s3, b3, H, W)

    # Input (PyTorch is NCHW); the kernel consumes the NHWC / folded slab.
    x_nchw = jax.random.normal(ks[19], (B, Cin, H, W), jnp.float32)
    x_nhwc = jnp.transpose(x_nchw, (0, 2, 3, 1))

    lane_np, sub_np = _roll_conventions()      # cached one-time probe

    out_nhwc = jax.block_until_ready(
        efficient_block_pallas(x_nhwc, params, H=H, W=W, w_fold=w_fold,
                               c_exp=C, lane_np=lane_np, sub_np=sub_np))
    out_nchw = jnp.transpose(out_nhwc, (0, 3, 1, 2))

    ref = reference_forward(
        x_nchw, (w1, s1, b1, wdw, s2, b2, wsq, bsq, wex, bex, w3, s3, b3, C))

    if not bool(jnp.allclose(out_nchw, ref, atol=2e-3, rtol=2e-3)):
        err = float(jnp.max(jnp.abs(out_nchw - ref)))
        raise AssertionError(
            f"Pallas output does not match reference (max abs err {err})")
    print("KERNEL_OK")
</pallas_src>

<mosaic_0001>
module attributes {stable_mosaic.version = 11 : i64} {
  func.func @lane_probe(%arg0: memref<8x128xf32, #tpu.memory_space<vmem>>, %arg1: memref<8x128xf32, #tpu.memory_space<vmem>>) attributes {dimension_semantics = [], scalar_prefetch = 0 : i64, scratch_operands = 0 : i64, tpu.core_type = #tpu.core_type<tc>} {
    %c0 = arith.constant 0 : index
    %c0_0 = arith.constant 0 : index
    %0 = vector.load %arg0[%c0, %c0_0] : memref<8x128xf32, #tpu.memory_space<vmem>>, vector<8x128xf32>
    %c1_i32 = arith.constant 1 : i32
    %1 = tpu.dynamic_rotate %0 by %c1_i32 dim 1 : vector<8x128xf32>, i32 -> vector<8x128xf32>
    %c0_1 = arith.constant 0 : index
    %c0_2 = arith.constant 0 : index
    %2 = vector.load %arg1[%c0_1, %c0_2] : memref<8x128xf32, #tpu.memory_space<vmem>>, vector<8x128xf32>
    tpu.vector_store %arg1[%c0_1, %c0_2], %1 {strides = array<i32>} : memref<8x128xf32, #tpu.memory_space<vmem>>, vector<8x128xf32>,
    return
  }
}

</mosaic_0001>

<bundles_post_ra>
// kernel: tpu_custom_call.1
= control target key start
LH: loop header
LB: loop body
LE: loop exit
PB: predicated region body
PF: predicated region fallthrough
CT: control target
= control target key end

     0   :  { %6 = vsyncpa [#allocation3], 0  ;;  %s106_s0 = inlined_call_operand.hbm [shape: f32[8,128], index: 0, kind: input, shape index: {}]   ;;  %s107_s1 = inlined_call_operand.hbm [shape: f32[8,128], index: 1, kind: output, shape index: {}]  }
   0x1   :  { %7 = vsyncpa [#allocation4], 0  ;;  %s87_s6 = smov [#allocation2]  }
   0x2   :  { %s14_s7 = sshll.u32 %s87_s6, 4  ;;  %s15_s7 = int_to_ptr.vmem [resolvable:$true] %s14_s7 }
   0x3   :  { %s51_s8 = scalar_lea.vmem %s15_s7, 128  ;;  %p56_p1 = scmp.lt.s32.totalorder %s15_s7, %s15_s7 }
   0x4   :  { %p52_p0 = scmp.ne.s32.totalorder %s15_s7, %s51_s8  ;;  %p57_p2 = scmp.lt.s32.totalorder %s51_s8, %s51_s8 }
   0x6   :  { %p58_p3 = por %p57_p2, %p56_p1 }
   0x8   :  { %p59_p4 = pnand %p58_p3, %p52_p0 }
   0xa   :  { %62 = shalt.err (!%p59_p4)
}
   0xb   :  { %17 = dma.hbm_to_vmem [thread:$0]  %s106_s0, 128, %s15_s7, [#allocation3]  }
   0xc   :  { %83 = dma.done.wait [#allocation3], 128  }
   0xd   :  { %84 = vsyncadd [#allocation3], 4294967168  ;;  %v21_v0 = vld [vmem:[#allocation2] sm:$0xff]  ;;  %s88_s11 = smov 1   ;;  %s89_s12 = smov [#allocation5]  }
   0xe   :  { %22 = vrot.lane.b32.xlu0 %v21_v0, %s88_s11  ;;  %s31_s13 = sshll.u32 %s89_s12, 4  ;;  %s32_s13 = int_to_ptr.vmem [resolvable:$true] %s31_s13 }
   0xf   :  { %s63_s14 = scalar_lea.vmem %s32_s13, 128  ;;  %p68_p6 = scmp.lt.s32.totalorder %s32_s13, %s32_s13 }
  0x10   :  { %p64_p5 = scmp.ne.s32.totalorder %s32_s13, %s63_s14  ;;  %p69_p7 = scmp.lt.s32.totalorder %s63_s14, %s63_s14 }
  0x12   :  { %p70_p8 = por %p69_p7, %p68_p6 }
  0x14   :  { %p71_p9 = pnand %p70_p8, %p64_p5 }
  0x80   :  { %v23_v1 = vpop.permute.xlu0 %22 }
  0x81   :  { %24 = vst [vmem:[#allocation5] sm:$0xff] %v23_v1 }
  0x82   :  { %74 = shalt.err (!%p71_p9)
}
  0x83   :  { %34 = dma.vmem_to_hbm [thread:$0]  %s32_s13, 128, %s107_s1, [#allocation4]  }
  0x84   :  { %85 = dma.done.wait [#allocation4], 128  }
  0x85   :  { %86 = vsyncadd [#allocation4], 4294967168 }
  0x86   :  { %38 = vsyncpa [#allocation3], 1 }
  0x87   :  { %39 = vsyncpa [#allocation4], 1 }

</bundles_post_ra>
